<compile_context>
chip_gen: v7x
topology: tpu7x:2x2x1
jax: 0.10.0
libtpu: 0.0.40
codegen_flags: <defaults>
</compile_context>

<pallas_src>
import jax
import jax.numpy as jnp
from jax.experimental import pallas as pl
from jax.experimental.pallas import tpu as pltpu


def _gnnsa_j_kernel(x_ref, a_ref, p_ref, e_ref, t_ref, o_ref):
    # x_ref: (G*na, d)   a_ref: (d, h)
    # p_ref: (G, G*na)   e_ref: (G*na, na)   t_ref: (na, K_pad)
    # o_ref: (G, K_pad)
    z = jnp.dot(x_ref[...], a_ref[...],
                preferred_element_type=jnp.float32)          # MXU (bf16 in, f32 acc)
    silu = z * jax.nn.sigmoid(z)                             # VPU + EUP
    s = jnp.sum(silu, axis=1, keepdims=True)                 # (G*na, 1) lane reduce
    # Route per-row sums into (G, na) "j12" layout with tiny resident selectors
    # (no in-kernel reshape, everything stays a plain 2-D op).
    s_gna = jnp.dot(p_ref[...], s * e_ref[...],
                    preferred_element_type=jnp.float32)      # (G, na)
    # Each flat-J element has exactly one +/-1 contribution, so this dot just
    # places +/-s into its lane-dense position (unmasked vst).
    o_ref[...] = jnp.dot(s_gna, t_ref[...],
                         preferred_element_type=jnp.float32).astype(o_ref.dtype)


def _vmem_budget_and_cores():
    """Generation-aware VMEM budget (bytes) and TensorCore-count heuristic."""
    info = None
    try:
        info = pltpu.get_tpu_info()
        cap = int(info.vmem_capacity_bytes)
    except Exception:
        cap = 64 << 20                      # conservative (v7x-sized per-core VMEM)
    cores = None
    if info is not None:
        for name in ("num_cores", "cores_per_chip", "num_tensorcores"):
            val = getattr(info, name, None)
            if isinstance(val, int) and val > 0:
                cores = val
                break
    if cores is None:
        # v7x-class: 64 MiB VMEM per core, 2 TCs; v5e/v6e: 128 MiB, 1 TC.
        cores = 2 if cap <= (64 << 20) else 1
    return int(cap * 0.70), cores


def _choose_group_size(Bn, na, d, h, K_pad, in_bytes, budget, multi_core):
    """Pick G (output groups per grid step): divisor of Bn, 8-aligned (or == Bn)."""

    def footprint(G):
        rows = G * na
        return (2 * rows * d * in_bytes                      # x block (2 buffers)
                + d * h * in_bytes                           # A (resident, 1 buffer)
                + (G * rows + rows * na + na * K_pad) * 4    # P, E, T (resident)
                + 2 * G * K_pad * 4                          # out block (2 buffers)
                + 2 * rows * h * 4                           # z / silu f32 temps
                + (rows + rows * na + G * na) * 4            # s, s*E, s_gna
                + (2 << 20))                                 # compiler scratch slack

    legal = [G for G in range(1, Bn + 1)
             if Bn % G == 0 and (G == Bn or G % 8 == 0)]
    fitting = [G for G in legal if footprint(G) <= budget]
    pool = fitting if fitting else [min(legal, key=footprint)]

    def score(G):
        rows = G * na
        steps = Bn // G
        if multi_core:
            # Keep both TensorCores busy: prefer even, >= 2 step counts.
            return ((steps >= 2 and steps % 2 == 0), -abs(rows - 256))
        # Single TensorCore: grid is a sequential loop -- take the largest G
        # that fits (fewest ~0.35us steps, tallest MXU tiles).
        return (rows, 0)

    G = max(pool, key=score)
    return G, footprint(G)


def _build_routing(G, na, K, K_pad):
    """Grid-invariant selector / placement matrices (hoisted out of the kernel)."""
    rows = G * na
    two_na, four_na = 2 * na, 4 * na
    r = jnp.arange(rows)
    # P[g, r] = [local row r belongs to local group g]
    P = (r[None, :] // na == jnp.arange(G)[:, None]).astype(jnp.float32)
    # E[r, a] = [r % na == a]
    E = ((r % na)[:, None] == jnp.arange(na)[None, :]).astype(jnp.float32)
    # T[a, k]: signed placement of agent a into flat-J position k.
    k = jnp.arange(K_pad)
    R = k // four_na
    C = k % four_na
    valid = k < K
    sign = jnp.where(valid & (R < two_na) & (C == R + two_na), 1.0,
                     jnp.where(valid & (R >= two_na) & (C == R - two_na),
                               -1.0, 0.0))
    agent = (R % two_na) // 2
    T = (jnp.arange(na)[:, None] == agent[None, :]).astype(jnp.float32) * sign[None, :]
    return P, E, T


def gnnsa_j_forward(x, A, *, input_dtype=jnp.bfloat16):
    B, d = x.shape
    h = A.shape[1]
    assert d % 4 == 0, "feature dim must be divisible by 4"
    na = d // 4
    assert h == 16 * na, "module requires h == 4*d so J reshapes to (B, 16, na)"
    assert B % na == 0, "batch must be divisible by na = d/4"
    Bn = B // na
    four_na = 4 * na
    K = 16 * na * na
    K_pad = ((K + 127) // 128) * 128          # lane-dense (unmasked) output stores

    in_bytes = jnp.dtype(input_dtype).itemsize
    budget, cores = _vmem_budget_and_cores()
    G, fp = _choose_group_size(Bn, na, d, h, K_pad, in_bytes, budget, cores >= 2)
    rows = G * na
    steps = Bn // G

    xk = x.astype(input_dtype)
    Ak = A.astype(input_dtype)
    P, E, T = _build_routing(G, na, K, K_pad)

    vmem_limit = int(min(budget, max(32 << 20, 2 * fp)))

    cost = pl.CostEstimate(
        flops=2 * B * d * h + 2 * Bn * (rows * na + na * K_pad) + 4 * B * h,
        transcendentals=B * h,
        bytes_accessed=(B * d * in_bytes + d * h * in_bytes
                        + (G * rows + rows * na + na * K_pad) * 4
                        + Bn * K_pad * 4),
    )

    def call(single_buffer_residents):
        def resident(shape):
            if single_buffer_residents:
                # Grid-invariant operand -> no point double-buffering it.
                return pl.BlockSpec(shape, lambda g: (0, 0),
                                    pipeline_mode=pl.Buffered(1))
            return pl.BlockSpec(shape, lambda g: (0, 0))

        return pl.pallas_call(
            _gnnsa_j_kernel,
            out_shape=jax.ShapeDtypeStruct((Bn, K_pad), jnp.float32),
            grid=(steps,),
            in_specs=[
                pl.BlockSpec((rows, d), lambda g: (g, 0)),   # G*na input rows
                resident((d, h)),                            # weights A
                resident((G, rows)),                         # group selector P
                resident((rows, na)),                        # agent selector E
                resident((na, K_pad)),                       # signed placement T
            ],
            out_specs=pl.BlockSpec((G, K_pad), lambda g: (g, 0)),
            compiler_params=pltpu.CompilerParams(
                dimension_semantics=("parallel",),
                vmem_limit_bytes=vmem_limit),
            cost_estimate=cost,
        )(xk, Ak, P, E, T)

    try:
        out_flat = call(True)
    except Exception:
        # Installed Pallas may not support BlockSpec(pipeline_mode=...).
        out_flat = call(False)

    return out_flat[:, :K].reshape(Bn, four_na, four_na)


def gnnsa_j_reference(x, A):
    """Pure-JAX reference mirroring the PyTorch forward."""
    B, d = x.shape
    na = d // 4
    Bn = B // na
    z = jax.nn.silu(x @ A)                          # (B, h)
    s = z.sum(axis=1).reshape(Bn, na)               # j12
    eye_na = jnp.eye(na, dtype=jnp.float32)
    eye2 = jnp.eye(2, dtype=jnp.float32)
    J12 = jnp.einsum("gij,ab->giajb",
                     s[:, :, None] * eye_na[None], eye2).reshape(Bn, 2 * na, 2 * na)
    zeros = jnp.zeros_like(J12)
    top = jnp.concatenate([zeros, J12], axis=2)
    bottom = jnp.concatenate([-J12, zeros], axis=2)
    return jnp.concatenate([top, bottom], axis=1)


if __name__ == "__main__":
    d = 16              # feature dim -> na = 4
    h = 4 * d           # = 64, required by the module's reshape
    na = d // 4
    Bn = 16             # output groups
    B = Bn * na         # batch = 64

    key = jax.random.PRNGKey(0)
    kx, ka = jax.random.split(key)
    x = jax.random.normal(kx, (B, d), dtype=jnp.float32)
    A = 0.6 * jax.random.normal(ka, (d, h), dtype=jnp.float32)

    ref = gnnsa_j_reference(x, A)
    scale = float(jnp.max(jnp.abs(ref)))

    # Default path: bf16 MXU inputs, f32 accumulation / routing.
    out = jax.block_until_ready(gnnsa_j_forward(x, A))
    assert out.shape == (Bn, 4 * na, 4 * na)
    assert float(jnp.max(jnp.abs(out - ref))) <= 1e-2 * scale + 1e-5

    # Full f32 path: placement is exact, tight tolerance.
    out_f32 = jax.block_until_ready(gnnsa_j_forward(x, A, input_dtype=jnp.float32))
    assert float(jnp.max(jnp.abs(out_f32 - ref))) <= 1e-4 * scale + 1e-6

    print("KERNEL_OK")
</pallas_src>

<mosaic_0001>
module attributes {stable_mosaic.version = 11 : i64} {
  func.func @_gnnsa_j_kernel(%arg0: i32, %arg1: memref<32x16xbf16, #tpu.memory_space<vmem>>, %arg2: memref<16x64xbf16, #tpu.memory_space<vmem>>, %arg3: memref<8x32xf32, #tpu.memory_space<vmem>>, %arg4: memref<32x4xf32, #tpu.memory_space<vmem>>, %arg5: memref<4x256xf32, #tpu.memory_space<vmem>>, %arg6: memref<8x256xf32, #tpu.memory_space<vmem>>) attributes {dimension_semantics = [#tpu.dimension_semantics<parallel>], iteration_bounds = array<i64: 2>, scalar_prefetch = 0 : i64, scratch_operands = 0 : i64, tpu.core_type = #tpu.core_type<tc>, window_params = [{transform_indices = @transform_0, window_bounds = array<i64: 32, 16>}, {pipeline_mode = #tpu.pipeline_mode<synchronous>, transform_indices = @transform_1, window_bounds = array<i64: 16, 64>}, {pipeline_mode = #tpu.pipeline_mode<synchronous>, transform_indices = @transform_2, window_bounds = array<i64: 8, 32>}, {pipeline_mode = #tpu.pipeline_mode<synchronous>, transform_indices = @transform_3, window_bounds = array<i64: 32, 4>}, {pipeline_mode = #tpu.pipeline_mode<synchronous>, transform_indices = @transform_4, window_bounds = array<i64: 4, 256>}, {transform_indices = @transform_5, window_bounds = array<i64: 8, 256>}]} {
    %c0 = arith.constant 0 : index
    %c0_0 = arith.constant 0 : index
    %0 = vector.load %arg1[%c0, %c0_0] : memref<32x16xbf16, #tpu.memory_space<vmem>>, vector<32x16xbf16>
    %c0_1 = arith.constant 0 : index
    %c0_2 = arith.constant 0 : index
    %1 = vector.load %arg2[%c0_1, %c0_2] : memref<16x64xbf16, #tpu.memory_space<vmem>>, vector<16x64xbf16>
    %cst = arith.constant dense<0.000000e+00> : vector<32x64xf32>
    %2 = tpu.matmul %0, %1, %cst {dimension_numbers = #tpu.dot_dimension_numbers<[1], [0], [0], [1], [0, 0, 1, 1], [], []>} : vector<32x16xbf16>, vector<16x64xbf16>, vector<32x64xf32> -> vector<32x64xf32>
    %3 = arith.negf %2 : vector<32x64xf32>
    %4 = math.exp %3 : vector<32x64xf32>
    %cst_3 = arith.constant 1.000000e+00 : f32
    %5 = vector.broadcast %cst_3 : f32 to vector<32x64xf32>
    %6 = arith.addf %5, %4 : vector<32x64xf32>
    %7 = arith.divf %5, %6 : vector<32x64xf32>
    %8 = arith.mulf %2, %7 : vector<32x64xf32>
    %cst_4 = arith.constant dense<0.000000e+00> : vector<32xf32>
    %9 = vector.multi_reduction <add>, %8, %cst_4 [1] : vector<32x64xf32> to vector<32xf32>
    %10 = vector.shape_cast %9 : vector<32xf32> to vector<32x1xf32>
    %c0_5 = arith.constant 0 : index
    %c0_6 = arith.constant 0 : index
    %11 = vector.load %arg3[%c0_5, %c0_6] : memref<8x32xf32, #tpu.memory_space<vmem>>, vector<8x32xf32>
    %c0_7 = arith.constant 0 : index
    %c0_8 = arith.constant 0 : index
    %12 = vector.load %arg4[%c0_7, %c0_8] : memref<32x4xf32, #tpu.memory_space<vmem>>, vector<32x4xf32>
    %13 = vector.broadcast %10 : vector<32x1xf32> to vector<32x4xf32>
    %14 = arith.mulf %13, %12 : vector<32x4xf32>
    %cst_9 = arith.constant dense<0.000000e+00> : vector<8x4xf32>
    %15 = tpu.matmul %11, %14, %cst_9 {dimension_numbers = #tpu.dot_dimension_numbers<[1], [0], [0], [1], [0, 0, 1, 1], [], []>} : vector<8x32xf32>, vector<32x4xf32>, vector<8x4xf32> -> vector<8x4xf32>
    %c0_10 = arith.constant 0 : index
    %c0_11 = arith.constant 0 : index
    %16 = vector.load %arg5[%c0_10, %c0_11] : memref<4x256xf32, #tpu.memory_space<vmem>>, vector<4x256xf32>
    %cst_12 = arith.constant dense<0.000000e+00> : vector<8x256xf32>
    %17 = tpu.matmul %15, %16, %cst_12 {dimension_numbers = #tpu.dot_dimension_numbers<[1], [0], [0], [1], [0, 0, 1, 1], [], []>} : vector<8x4xf32>, vector<4x256xf32>, vector<8x256xf32> -> vector<8x256xf32>
    %c0_13 = arith.constant 0 : index
    %c0_14 = arith.constant 0 : index
    %18 = vector.load %arg6[%c0_13, %c0_14] : memref<8x256xf32, #tpu.memory_space<vmem>>, vector<8x256xf32>
    tpu.vector_store %arg6[%c0_13, %c0_14], %17 {strides = array<i32>} : memref<8x256xf32, #tpu.memory_space<vmem>>, vector<8x256xf32>,
    return
  }
  func.func @transform_0(%arg0: i32) -> (i32, i32) {
    %c0_i32 = arith.constant 0 : i32
    %c0_i32_0 = arith.constant 0 : i32
    return %arg0, %c0_i32 : i32, i32
  }
  func.func @transform_1(%arg0: i32) -> (i32, i32) {
    %c0_i32 = arith.constant 0 : i32
    %c0_i32_0 = arith.constant 0 : i32
    %c0_i32_1 = arith.constant 0 : i32
    return %c0_i32, %c0_i32_0 : i32, i32
  }
  func.func @transform_2(%arg0: i32) -> (i32, i32) {
    %c0_i32 = arith.constant 0 : i32
    %c0_i32_0 = arith.constant 0 : i32
    %c0_i32_1 = arith.constant 0 : i32
    return %c0_i32, %c0_i32_0 : i32, i32
  }
  func.func @transform_3(%arg0: i32) -> (i32, i32) {
    %c0_i32 = arith.constant 0 : i32
    %c0_i32_0 = arith.constant 0 : i32
    %c0_i32_1 = arith.constant 0 : i32
    return %c0_i32, %c0_i32_0 : i32, i32
  }
  func.func @transform_4(%arg0: i32) -> (i32, i32) {
    %c0_i32 = arith.constant 0 : i32
    %c0_i32_0 = arith.constant 0 : i32
    %c0_i32_1 = arith.constant 0 : i32
    return %c0_i32, %c0_i32_0 : i32, i32
  }
  func.func @transform_5(%arg0: i32) -> (i32, i32) {
    %c0_i32 = arith.constant 0 : i32
    %c0_i32_0 = arith.constant 0 : i32
    return %arg0, %c0_i32 : i32, i32
  }
}

module attributes {stable_mosaic.version = 11 : i64} {
  func.func @_gnnsa_j_kernel(%arg0: i32, %arg1: memref<32x16xbf16, #tpu.memory_space<vmem>>, %arg2: memref<16x64xbf16, #tpu.memory_space<vmem>>, %arg3: memref<8x32xf32, #tpu.memory_space<vmem>>, %arg4: memref<32x4xf32, #tpu.memory_space<vmem>>, %arg5: memref<4x256xf32, #tpu.memory_space<vmem>>, %arg6: memref<8x256xf32, #tpu.memory_space<vmem>>) attributes {dimension_semantics = [#tpu.dimension_semantics<parallel>], iteration_bounds = array<i64: 2>, scalar_prefetch = 0 : i64, scratch_operands = 0 : i64, tpu.core_type = #tpu.core_type<tc>, window_params = [{transform_indices = @transform_0, window_bounds = array<i64: 32, 16>}, {pipeline_mode = #tpu.pipeline_mode<synchronous>, transform_indices = @transform_1, window_bounds = array<i64: 16, 64>}, {pipeline_mode = #tpu.pipeline_mode<synchronous>, transform_indices = @transform_2, window_bounds = array<i64: 8, 32>}, {pipeline_mode = #tpu.pipeline_mode<synchronous>, transform_indices = @transform_3, window_bounds = array<i64: 32, 4>}, {pipeline_mode = #tpu.pipeline_mode<synchronous>, transform_indices = @transform_4, window_bounds = array<i64: 4, 256>}, {transform_indices = @transform_5, window_bounds = array<i64: 8, 256>}]} {
    %c0 = arith.constant 0 : index
    %c0_0 = arith.constant 0 : index
    %0 = vector.load %arg1[%c0, %c0_0] : memref<32x16xbf16, #tpu.memory_space<vmem>>, vector<32x16xbf16>
    %c0_1 = arith.constant 0 : index
    %c0_2 = arith.constant 0 : index
    %1 = vector.load %arg2[%c0_1, %c0_2] : memref<16x64xbf16, #tpu.memory_space<vmem>>, vector<16x64xbf16>
    %cst = arith.constant dense<0.000000e+00> : vector<32x64xf32>
    %2 = tpu.matmul %0, %1, %cst {dimension_numbers = #tpu.dot_dimension_numbers<[1], [0], [0], [1], [0, 0, 1, 1], [], []>} : vector<32x16xbf16>, vector<16x64xbf16>, vector<32x64xf32> -> vector<32x64xf32>
    %3 = arith.negf %2 : vector<32x64xf32>
    %4 = math.exp %3 : vector<32x64xf32>
    %cst_3 = arith.constant 1.000000e+00 : f32
    %5 = vector.broadcast %cst_3 : f32 to vector<32x64xf32>
    %6 = arith.addf %5, %4 : vector<32x64xf32>
    %7 = arith.divf %5, %6 : vector<32x64xf32>
    %8 = arith.mulf %2, %7 : vector<32x64xf32>
    %cst_4 = arith.constant dense<0.000000e+00> : vector<32xf32>
    %9 = vector.multi_reduction <add>, %8, %cst_4 [1] : vector<32x64xf32> to vector<32xf32>
    %10 = vector.shape_cast %9 : vector<32xf32> to vector<32x1xf32>
    %c0_5 = arith.constant 0 : index
    %c0_6 = arith.constant 0 : index
    %11 = vector.load %arg3[%c0_5, %c0_6] : memref<8x32xf32, #tpu.memory_space<vmem>>, vector<8x32xf32>
    %c0_7 = arith.constant 0 : index
    %c0_8 = arith.constant 0 : index
    %12 = vector.load %arg4[%c0_7, %c0_8] : memref<32x4xf32, #tpu.memory_space<vmem>>, vector<32x4xf32>
    %13 = vector.broadcast %10 : vector<32x1xf32> to vector<32x4xf32>
    %14 = arith.mulf %13, %12 : vector<32x4xf32>
    %cst_9 = arith.constant dense<0.000000e+00> : vector<8x4xf32>
    %15 = tpu.matmul %11, %14, %cst_9 {dimension_numbers = #tpu.dot_dimension_numbers<[1], [0], [0], [1], [0, 0, 1, 1], [], []>} : vector<8x32xf32>, vector<32x4xf32>, vector<8x4xf32> -> vector<8x4xf32>
    %c0_10 = arith.constant 0 : index
    %c0_11 = arith.constant 0 : index
    %16 = vector.load %arg5[%c0_10, %c0_11] : memref<4x256xf32, #tpu.memory_space<vmem>>, vector<4x256xf32>
    %cst_12 = arith.constant dense<0.000000e+00> : vector<8x256xf32>
    %17 = tpu.matmul %15, %16, %cst_12 {dimension_numbers = #tpu.dot_dimension_numbers<[1], [0], [0], [1], [0, 0, 1, 1], [], []>} : vector<8x4xf32>, vector<4x256xf32>, vector<8x256xf32> -> vector<8x256xf32>
    %c0_13 = arith.constant 0 : index
    %c0_14 = arith.constant 0 : index
    %18 = vector.load %arg6[%c0_13, %c0_14] : memref<8x256xf32, #tpu.memory_space<vmem>>, vector<8x256xf32>
    tpu.vector_store %arg6[%c0_13, %c0_14], %17 {strides = array<i32>} : memref<8x256xf32, #tpu.memory_space<vmem>>, vector<8x256xf32>,
    return
  }
  func.func @transform_0(%arg0: i32) -> (i32, i32) {
    %c0_i32 = arith.constant 0 : i32
    %c0_i32_0 = arith.constant 0 : i32
    return %arg0, %c0_i32 : i32, i32
  }
  func.func @transform_1(%arg0: i32) -> (i32, i32) {
    %c0_i32 = arith.constant 0 : i32
    %c0_i32_0 = arith.constant 0 : i32
    %c0_i32_1 = arith.constant 0 : i32
    return %c0_i32, %c0_i32_0 : i32, i32
  }
  func.func @transform_2(%arg0: i32) -> (i32, i32) {
    %c0_i32 = arith.constant 0 : i32
    %c0_i32_0 = arith.constant 0 : i32
    %c0_i32_1 = arith.constant 0 : i32
    return %c0_i32, %c0_i32_0 : i32, i32
  }
  func.func @transform_3(%arg0: i32) -> (i32, i32) {
    %c0_i32 = arith.constant 0 : i32
    %c0_i32_0 = arith.constant 0 : i32
    %c0_i32_1 = arith.constant 0 : i32
    return %c0_i32, %c0_i32_0 : i32, i32
  }
  func.func @transform_4(%arg0: i32) -> (i32, i32) {
    %c0_i32 = arith.constant 0 : i32
    %c0_i32_0 = arith.constant 0 : i32
    %c0_i32_1 = arith.constant 0 : i32
    return %c0_i32, %c0_i32_0 : i32, i32
  }
  func.func @transform_5(%arg0: i32) -> (i32, i32) {
    %c0_i32 = arith.constant 0 : i32
    %c0_i32_0 = arith.constant 0 : i32
    return %arg0, %c0_i32 : i32, i32
  }
}

</mosaic_0001>

<bundles_post_ra>
// kernel: tpu_custom_call.1
= control target key start
LH: loop header
LB: loop body
LE: loop exit
PB: predicated region body
PF: predicated region fallthrough
CT: control target
= control target key end

     0   :  { %10 = vsyncpa [#allocation3], 0  ;;  %s924_s0 = inlined_call_operand.vmem [shape: bf16[64,16], index: 0, kind: input, shape index: {}]   ;;  %s925_s1 = inlined_call_operand.vmem [shape: bf16[16,64], index: 1, kind: input, shape index: {}]   ;;  %s926_s2 = inlined_call_operand.vmem [shape: f32[8,32], index: 2, kind: input, shape index: {}]   ;;  %s927_s3 = inlined_call_operand.vmem [shape: f32[32,4], index: 3, kind: input, shape index: {}]   ;;  %s928_s4 = inlined_call_operand.vmem [shape: f32[4,256], index: 4, kind: input, shape index: {}]   ;;  %s929_s5 = inlined_call_operand.hbm [shape: f32[16,256], index: 5, kind: output, shape index: {}]  }
   0x1   :  { %12 = vsyncpa [#allocation3 + $0x1], 0  ;;  %s804_s18 = smov 0   ;;  %s806_s19 = smov 0  }
   0x2   :  { %s808_s20 = smov 0   ;;  %s810_s21 = smov 0  }
   0x3 LB: > { %s825_s22 = sadd.s32 4294967295, %s768_s21   ;;  %s587_s23 = sadd.s32 4294967294, %s768_s21   ;;  %s768_s21 = sphi %s810_s21, %s935_s21   ;;  %s764_s20 = sphi %s808_s20, %s934_s20   ;;  %s760_s19 = sphi %s806_s19, %s933_s19   ;;  %s756_s18 = sphi %s804_s18, %s932_s18  }
   0x4   : > { %s829_s24 = sadd.s32 1, %s768_s21   ;;  %s135_s25 = sadd.s32 1, %s764_s20 }
   0x5   : > { %s132_s26 = ssub.s32 %s768_s21, %s829_s24  ;;  %p145_p0 = scmp.ne.s32.totalorder %s764_s20, %s760_s19 }
   0x6   : > { %p133_p1 = scmp.eq.s32.totalorder %s132_s26, 0  ;;  %p146_p2 = scmp.eq.s32.totalorder %s825_s22, 1 }
   0x7   : > { %p151_p3 = scmp.ne.s32.totalorder %s760_s19, %s756_s18  ;;  %p152_p4 = scmp.eq.s32.totalorder %s587_s23, 1 }
   0x8   : > { %s840_s27 = scalar_select %p133_p1, %s764_s20, %s135_s25  }
   0x9   : > { %p842_p5 = por %p146_p2, %p145_p0  ;;  %p846_p6 = por %p152_p4, %p151_p3 }
   0xa   : > { %p590_p7 = scmp.ge.s32.totalorder %s768_s21, 1  ;;  %p191_p8 = scmp.lt.s32.totalorder %s768_s21, 3 }
   0xc   : > { %p192_p9 = pnand %p590_p7, %p191_p8 }
   0xd   : > { %v686_v0 = vld [vmem:[%s925_s1] sm:$0xff] (!%p192_p9)   ;;  %s592_s7 = sshll.u32 (!%p192_p9), %s825_s22, 2  ;;  %vm248_vm0 = vcmask (!%p192_p9), 130048   ;;  %vm332_vm1 = vcmask (!%p192_p9), 523264   ;;  %v770_v31 = vmov (!%p192_p9), 0.0|0.0   ;;  %vm771_vm2 = vmmov (!%p192_p9), 0  }
   0xe   : > { %195 = sbr.rel (%p192_p9) target bundleno = 864 (0x360), region = 40  ;;  %p220_p10 = scmp.lt.s32.totalorder (!%p192_p9), %s592_s7, 7  ;;  %621 = vmatprep.subr.bf16.mxu0 (!%p192_p9), %v686_v0  ;;  %638 = vmatprep.subr.bf16.mxu1 (!%p192_p9), %v770_v31  ;;  %v772_v32 = vmov (!%p192_p9), 0.0   ;;  %v428_v33 = vld [vmem:[%s928_s4] sm:$0xff] (!%p192_p9)  ;;  %vm435_vm3 = vcmask (!%p192_p9), 1043456   ;;  %v347_v38 = vld [vmem:[%s927_s3 + $0x8] sm:$0xff] (!%p192_p9) }
   0xf   : > { %622 = vmatpush3.bf16.msra.mxu0 (!%p192_p9), %v686_v0  ;;  %635 = vmatprep.mubr.msk.f32.mxu1 (!%p192_p9), %vm771_vm2, %v772_v32  ;;  %v430_v34 = vcombine.high (!%p192_p9), %v428_v33, %v428_v33  ;;  %v346_v37 = vld [vmem:[%s927_s3] sm:$0xff] (!%p192_p9)  ;;  %v349_v39 = vld [vmem:[%s927_s3 + $0x18] sm:$0xff] (!%p192_p9)  ;;  %v348_v44 = vld [vmem:[%s927_s3 + $0x10] sm:$0xff] (!%p192_p9)  ;;  %vm354_vm4 = vcmask (!%p192_p9), 261120   ;;  %vm431_vm5 = vcmask (!%p192_p9), 31744   ;;  %s612_s12 = sshll.u32 (!%p192_p9), %s825_s22, 8 }
  0x10   : > { %v345_v49 = vld [vmem:[%s926_s2] sm:$0xff] (!%p192_p9)  ;;  %s884_s15 = scalar_lea.hbm (!%p192_p9), %s929_s5, %s612_s12  ;;  %s773_s22 = smov (!%p192_p9), [#allocation2]  }
  0x11   : > { %604 = vmatprep.subr.msk.mxu0 (!%p192_p9), %vm435_vm3, %v430_v34  ;;  %s710_s23 = sshll.u32 (!%p192_p9), %s773_s22, 4  ;;  %s711_s23 = int_to_ptr.vmem [resolvable:$false] %s710_s23 }
  0x12   : > { %s712_s25 = scalar_lea.vmem (!%p192_p9), %s711_s23, 512 }
  0x15   : > { %s937_s7 = smov (!%p220_p10, %s592_s7), 7 }
  0x16   : > { %s593_s8 = sshll.u32 %s937_s7, 2 }
  0x17   : > { %s223_s11 = scalar_lea.vmem %s924_s0, %s593_s8  ;;  %s216_s8 = sand.u32 1, %s760_s19  }
  0x18   : > { %v687_v1 = vld [vmem:[%s223_s11] sm:$0xff]   ;;  %v688_v2 = vld [vmem:[%s223_s11 + $0x8] sm:$0xff]   ;;  %s591_s9 = sshll.u32 %s216_s8, 4  ;;  %s514_s16 = scalar_lea.sflag [#allocation3], %s216_s8 }
  0x19   : > { %623 = vmatprep.mubr.msk.bf16.mxu0 %vm248_vm0, %v687_v1  ;;  %s218_s10 = scalar_lea.vmem [#allocation2], %s591_s9 }
  0x1a   : > { %624 = vmatmul.mubr.msk.bf16.vlgmr.msra.gmra.mrb[0].mxu0 %vm248_vm0, %v688_v2  ;;  %s528_s11 = sshll.u32 %s218_s10, 4  ;;  %s879_s11 = int_to_ptr.vmem [resolvable:$true] %s528_s11 }
  0x1b   : > { %504 = vmatprep.mubr.f32.mxu0 %v772_v32  ;;  %605 = vmatpush1.msk.msra.mxu0 %vm435_vm3, %v428_v33  ;;  %s706_s17 = scalar_lea.vmem %s879_s11, 256  ;;  %p713_p0 = scmp.lt.s32.totalorder %s879_s11, %s711_s23 }
  0x1c   : > { %p707_p11 = scmp.ne.s32.totalorder %s879_s11, %s706_s17  ;;  %p714_p1 = scmp.lt.s32.totalorder %s712_s25, %s706_s17 }
  0x1e   : > { %p708_p12 = pnand %p707_p11, %p842_p5  ;;  %p715_p2 = por %p714_p1, %p713_p0 }
  0x20   : > { %p709_p13 = pneg %p708_p12 }
  0x22   : > { %p716_p3 = pnand %p715_p2, %p709_p13 }
  0xed   : > { %v625_v3 = vpop.f32.mrb[0].mxu0 }
  0xee   : > { %v601_v4 = vmul.f32 -1.442695, %v625_v3  ;;  %v289_v5 = vpop.f32.mrb[1].mxu0 }
  0xef   : > { %v599_v6 = vmul.f32 -1.442695, %v289_v5  ;;  %v626_v7 = vpop.f32.mrb[2].mxu0 }
  0xf0   : > { %690 = vpow2.f32 %v601_v4  ;;  %v602_v8 = vmul.f32 -1.442695, %v626_v7  ;;  %v292_v9 = vpop.f32.mrb[3].mxu0 }
  0xf1   : > { %692 = vpow2.f32 %v599_v6  ;;  %v600_v10 = vmul.f32 -1.442695, %v292_v9 }
  0xf2   : > { %694 = vpow2.f32 %v602_v8 }
  0xf3   : > { %696 = vpow2.f32 %v600_v10 }
  0xfa   : > { %v691_v11 = vpop.eup %690 }
  0xfb   : > { %v693_v12 = vpop.eup %692  ;;  %v318_v13 = vadd.f32 1.0, %v691_v11 }
  0xfc   : > { %v695_v14 = vpop.eup %694  ;;  %v316_v15 = vadd.f32 1.0, %v693_v12 }
  0xfd   : > { %v697_v16 = vpop.eup %696  ;;  %698 = vrcp.f32 %v318_v13  ;;  %v319_v17 = vadd.f32 1.0, %v695_v14 }
  0xfe   : > { %700 = vrcp.f32 %v316_v15  ;;  %v317_v18 = vadd.f32 1.0, %v697_v16 }
  0xff   : > { %702 = vrcp.f32 %v319_v17 }
 0x100   : > { %704 = vrcp.f32 %v317_v18 }
 0x107   : > { %v699_v19 = vpop.eup %698 }
 0x108   : > { %v701_v20 = vpop.eup %700  ;;  %v330_v21 = vmul.f32 %v699_v19, %v625_v3 }
 0x109   : > { %v703_v22 = vpop.eup %702  ;;  %v328_v23 = vmul.f32 %v701_v20, %v289_v5 }
 0x10a   : > { %v705_v24 = vpop.eup %704  ;;  %v331_v25 = vmul.f32 %v703_v22, %v626_v7  ;;  %v339_v26 = vsel %vm332_vm1, %v330_v21, 0.0 }
 0x10b   : > { %v329_v27 = vmul.f32 %v705_v24, %v292_v9  ;;  %340 = vadd.xlane.f32.xlu1 %v339_v26  ;;  %v333_v28 = vsel %vm332_vm1, %v328_v23, 0.0 }
 0x10c   : > { %334 = vadd.xlane.f32.xlu0 %v333_v28  ;;  %v342_v29 = vsel %vm332_vm1, %v331_v25, 0.0 }
 0x10d   : > { %v336_v30 = vsel %vm332_vm1, %v329_v27, 0.0 }
 0x10f   : > { %343 = vadd.xlane.f32.xlu1 %v342_v29 }
 0x110   : > { %337 = vadd.xlane.f32.xlu0 %v336_v30 }
 0x198   : > { %v341_v35 = vpop.xlane.xlu1 %340 }
 0x199   : > { %v335_v36 = vpop.xlane.xlu0 %334  ;;  %v352_v47 = vmul.f32 %v348_v44, %v341_v35 }
 0x19a   : > { %v350_v42 = vmul.f32 %v346_v37, %v335_v36 }
 0x19c   : > { %v344_v40 = vpop.xlane.xlu1 %343 }
 0x19d   : > { %v338_v41 = vpop.xlane.xlu0 %337  ;;  %v353_v45 = vmul.f32 %v349_v39, %v344_v40 }
 0x19e   : > { %v351_v43 = vmul.f32 %v347_v38, %v338_v41 }
 0x19f   : > { %v642_v48 = vpack.c.bf16 %v353_v45, %v352_v47 }
 0x1a0   : > { %v639_v46 = vpack.c.bf16 %v351_v43, %v350_v42 }
 0x1a2   : > { %640 = vmatpush3.bf16.msra.mxu1 %v639_v46 }
 0x1a3   : > { %641 = vmatprep.subr.bf16.mxu1 %v770_v31 }
 0x1a6   : > { %643 = vmatpush3.bf16.msra.mxu1 %v642_v48 }
 0x1a9   : > { %636 = vmatmul.mubr.msk.f32.vlgmr.msra.gmra.mrb[0].mxu1 %vm354_vm4, %v345_v49 }
 0x27c   : > { %v424_v50 = vpop.f32.mrb[0].mxu1 }
 0x27d   : > { %v637_v51 = vpop.f32.mrb[1].mxu1  ;;  %606 = vmatmul.mubr.msk.f32.vlgmr.msra.gmra.mrb[4].mxu0 %vm431_vm5, %v424_v50 }
 0x350   : > { %v506_v52 = vpop.f32.mrb[4].mxu0 }
 0x351   : > { %511 = vst [vmem:[%s218_s10] sm:$0xff] %v506_v52  ;;  %v508_v53 = vpop.f32.mrb[5].mxu0 }
 0x352   : > { %512 = vst [vmem:[%s218_s10 + $0x8] sm:$0xff] %v508_v53 }
 0x353   : > { %719 = shalt.err (!%p716_p3)
}
 0x354   : > { %s720_s26 = scalar_lea.hbm %s884_s15, 256  ;;  %s724_s7 = scalar_lea.hbm %s929_s5, 512 }
 0x355   : > { %p721_p4 = scmp.ne.s32.totalorder %s884_s15, %s720_s26  ;;  %p725_p9 = scmp.lt.u32.totalorder %s884_s15, %s929_s5 }
 0x356   : > { %p726_p10 = scmp.lt.u32.totalorder %s724_s7, %s720_s26  ;;  %p728_p12 = scmp.lt.u32.totalorder %s720_s26, %s884_s15 }
 0x357   : > { %p722_p7 = pnand %p721_p4, %p842_p5 }
 0x358   : > { %p727_p11 = por %p726_p10, %p725_p9 }
 0x359   : > { %p723_p8 = pneg %p722_p7 }
 0x35a   : > { %p729_p13 = por %p728_p12, %p727_p11 }
 0x35c   : > { %p730_p0 = pnand %p729_p13, %p723_p8 }
 0x35e   : > { %733 = shalt.err (!%p730_p0)
}
 0x35f   : > { %644 = dma.vmem_to_hbm [thread:$0]  (%p842_p5), %s879_s11, 256, %s884_s15, %s514_s16  }
 0x360 PF: > { %p650_p1 = scmp.ge.s32.totalorder %s768_s21, 2  ;;  %s540_s10 = sand.u32 1, %s756_s18  }
 0x361   : > { %s541_s12 = scalar_lea.sflag [#allocation3], %s540_s10 }
 0x362   : > { %p647_p2 = pnand %p650_p1, %p846_p6 }
 0x364   : > { %751 = dma.done.wait (!%p647_p2), %s541_s12, 256  }
 0x365   : > { %753 = vsyncadd (!%p647_p2), %s541_s12, 4294967040  ;;  %p15_p3 = scmp.ge.s32.totalorder %s829_s24, 4   ;;  %s932_s18 = smov %s760_s19 }
 0x366   : > { %s933_s19 = smov %s764_s20  ;;  %s934_s20 = smov %s840_s27 }
 0x367   : > { %s935_s21 = smov %s829_s24  ;;  %17 = sbr.rel (!%p15_p3) target bundleno = 3 (0x3), region = 75 }
 0x36e   :  { %546 = vsyncpa [#allocation3], 1 }
 0x36f   :  { %548 = vsyncpa [#allocation3 + $0x1], 1 }

// kernel: tpu_custom_call.1
= control target key start
LH: loop header
LB: loop body
LE: loop exit
PB: predicated region body
PF: predicated region fallthrough
CT: control target
= control target key end

     0   :  { %10 = vsyncpa [#allocation3], 0  ;;  %s924_s0 = inlined_call_operand.vmem [shape: bf16[64,16], index: 0, kind: input, shape index: {}]   ;;  %s925_s1 = inlined_call_operand.vmem [shape: bf16[16,64], index: 1, kind: input, shape index: {}]   ;;  %s926_s2 = inlined_call_operand.vmem [shape: f32[8,32], index: 2, kind: input, shape index: {}]   ;;  %s927_s3 = inlined_call_operand.vmem [shape: f32[32,4], index: 3, kind: input, shape index: {}]   ;;  %s928_s4 = inlined_call_operand.vmem [shape: f32[4,256], index: 4, kind: input, shape index: {}]   ;;  %s929_s5 = inlined_call_operand.hbm [shape: f32[16,256], index: 5, kind: output, shape index: {}]  }
   0x1   :  { %12 = vsyncpa [#allocation3 + $0x1], 0  ;;  %s804_s18 = smov 0   ;;  %s806_s19 = smov 0  }
   0x2   :  { %s808_s20 = smov 0   ;;  %s810_s21 = smov 0  }
   0x3 LB: > { %s825_s22 = sadd.s32 4294967295, %s768_s21   ;;  %s587_s23 = sadd.s32 4294967294, %s768_s21   ;;  %s768_s21 = sphi %s810_s21, %s935_s21   ;;  %s764_s20 = sphi %s808_s20, %s934_s20   ;;  %s760_s19 = sphi %s806_s19, %s933_s19   ;;  %s756_s18 = sphi %s804_s18, %s932_s18  }
   0x4   : > { %s829_s24 = sadd.s32 1, %s768_s21   ;;  %s135_s25 = sadd.s32 1, %s764_s20 }
   0x5   : > { %s132_s26 = ssub.s32 %s768_s21, %s829_s24  ;;  %p145_p0 = scmp.ne.s32.totalorder %s764_s20, %s760_s19 }
   0x6   : > { %p133_p1 = scmp.eq.s32.totalorder %s132_s26, 0  ;;  %p146_p2 = scmp.eq.s32.totalorder %s825_s22, 1 }
   0x7   : > { %p151_p3 = scmp.ne.s32.totalorder %s760_s19, %s756_s18  ;;  %p152_p4 = scmp.eq.s32.totalorder %s587_s23, 1 }
   0x8   : > { %s840_s27 = scalar_select %p133_p1, %s764_s20, %s135_s25  }
   0x9   : > { %p842_p5 = por %p146_p2, %p145_p0  ;;  %p846_p6 = por %p152_p4, %p151_p3 }
   0xa   : > { %p590_p7 = scmp.ge.s32.totalorder %s768_s21, 1  ;;  %p191_p8 = scmp.lt.s32.totalorder %s768_s21, 3 }
   0xc   : > { %p192_p9 = pnand %p590_p7, %p191_p8 }
   0xd   : > { %v686_v0 = vld [vmem:[%s925_s1] sm:$0xff] (!%p192_p9)   ;;  %s592_s7 = sshll.u32 (!%p192_p9), %s825_s22, 2  ;;  %vm248_vm0 = vcmask (!%p192_p9), 130048   ;;  %vm332_vm1 = vcmask (!%p192_p9), 523264   ;;  %v770_v31 = vmov (!%p192_p9), 0.0|0.0   ;;  %vm771_vm2 = vmmov (!%p192_p9), 0  }
   0xe   : > { %195 = sbr.rel (%p192_p9) target bundleno = 864 (0x360), region = 40  ;;  %p220_p10 = scmp.lt.s32.totalorder (!%p192_p9), %s592_s7, 7  ;;  %621 = vmatprep.subr.bf16.mxu0 (!%p192_p9), %v686_v0  ;;  %638 = vmatprep.subr.bf16.mxu1 (!%p192_p9), %v770_v31  ;;  %v772_v32 = vmov (!%p192_p9), 0.0   ;;  %v428_v33 = vld [vmem:[%s928_s4] sm:$0xff] (!%p192_p9)  ;;  %vm435_vm3 = vcmask (!%p192_p9), 1043456   ;;  %v347_v38 = vld [vmem:[%s927_s3 + $0x8] sm:$0xff] (!%p192_p9) }
   0xf   : > { %622 = vmatpush3.bf16.msra.mxu0 (!%p192_p9), %v686_v0  ;;  %635 = vmatprep.mubr.msk.f32.mxu1 (!%p192_p9), %vm771_vm2, %v772_v32  ;;  %v430_v34 = vcombine.high (!%p192_p9), %v428_v33, %v428_v33  ;;  %v346_v37 = vld [vmem:[%s927_s3] sm:$0xff] (!%p192_p9)  ;;  %v349_v39 = vld [vmem:[%s927_s3 + $0x18] sm:$0xff] (!%p192_p9)  ;;  %v348_v44 = vld [vmem:[%s927_s3 + $0x10] sm:$0xff] (!%p192_p9)  ;;  %vm354_vm4 = vcmask (!%p192_p9), 261120   ;;  %vm431_vm5 = vcmask (!%p192_p9), 31744   ;;  %s612_s12 = sshll.u32 (!%p192_p9), %s825_s22, 8 }
  0x10   : > { %v345_v49 = vld [vmem:[%s926_s2] sm:$0xff] (!%p192_p9)  ;;  %s884_s15 = scalar_lea.hbm (!%p192_p9), %s929_s5, %s612_s12  ;;  %s773_s22 = smov (!%p192_p9), [#allocation2]  }
  0x11   : > { %604 = vmatprep.subr.msk.mxu0 (!%p192_p9), %vm435_vm3, %v430_v34  ;;  %s710_s23 = sshll.u32 (!%p192_p9), %s773_s22, 4  ;;  %s711_s23 = int_to_ptr.vmem [resolvable:$false] %s710_s23 }
  0x12   : > { %s712_s25 = scalar_lea.vmem (!%p192_p9), %s711_s23, 512 }
  0x15   : > { %s937_s7 = smov (!%p220_p10, %s592_s7), 7 }
  0x16   : > { %s593_s8 = sshll.u32 %s937_s7, 2 }
  0x17   : > { %s223_s11 = scalar_lea.vmem %s924_s0, %s593_s8  ;;  %s216_s8 = sand.u32 1, %s760_s19  }
  0x18   : > { %v687_v1 = vld [vmem:[%s223_s11] sm:$0xff]   ;;  %v688_v2 = vld [vmem:[%s223_s11 + $0x8] sm:$0xff]   ;;  %s591_s9 = sshll.u32 %s216_s8, 4  ;;  %s514_s16 = scalar_lea.sflag [#allocation3], %s216_s8 }
  0x19   : > { %623 = vmatprep.mubr.msk.bf16.mxu0 %vm248_vm0, %v687_v1  ;;  %s218_s10 = scalar_lea.vmem [#allocation2], %s591_s9 }
  0x1a   : > { %624 = vmatmul.mubr.msk.bf16.vlgmr.msra.gmra.mrb[0].mxu0 %vm248_vm0, %v688_v2  ;;  %s528_s11 = sshll.u32 %s218_s10, 4  ;;  %s879_s11 = int_to_ptr.vmem [resolvable:$true] %s528_s11 }
  0x1b   : > { %504 = vmatprep.mubr.f32.mxu0 %v772_v32  ;;  %605 = vmatpush1.msk.msra.mxu0 %vm435_vm3, %v428_v33  ;;  %s706_s17 = scalar_lea.vmem %s879_s11, 256  ;;  %p713_p0 = scmp.lt.s32.totalorder %s879_s11, %s711_s23 }
  0x1c   : > { %p707_p11 = scmp.ne.s32.totalorder %s879_s11, %s706_s17  ;;  %p714_p1 = scmp.lt.s32.totalorder %s712_s25, %s706_s17 }
  0x1e   : > { %p708_p12 = pnand %p707_p11, %p842_p5  ;;  %p715_p2 = por %p714_p1, %p713_p0 }
  0x20   : > { %p709_p13 = pneg %p708_p12 }
  0x22   : > { %p716_p3 = pnand %p715_p2, %p709_p13 }
  0xed   : > { %v625_v3 = vpop.f32.mrb[0].mxu0 }
  0xee   : > { %v601_v4 = vmul.f32 -1.442695, %v625_v3  ;;  %v289_v5 = vpop.f32.mrb[1].mxu0 }
  0xef   : > { %v599_v6 = vmul.f32 -1.442695, %v289_v5  ;;  %v626_v7 = vpop.f32.mrb[2].mxu0 }
  0xf0   : > { %690 = vpow2.f32 %v601_v4  ;;  %v602_v8 = vmul.f32 -1.442695, %v626_v7  ;;  %v292_v9 = vpop.f32.mrb[3].mxu0 }
  0xf1   : > { %692 = vpow2.f32 %v599_v6  ;;  %v600_v10 = vmul.f32 -1.442695, %v292_v9 }
  0xf2   : > { %694 = vpow2.f32 %v602_v8 }
  0xf3   : > { %696 = vpow2.f32 %v600_v10 }
  0xfa   : > { %v691_v11 = vpop.eup %690 }
  0xfb   : > { %v693_v12 = vpop.eup %692  ;;  %v318_v13 = vadd.f32 1.0, %v691_v11 }
  0xfc   : > { %v695_v14 = vpop.eup %694  ;;  %v316_v15 = vadd.f32 1.0, %v693_v12 }
  0xfd   : > { %v697_v16 = vpop.eup %696  ;;  %698 = vrcp.f32 %v318_v13  ;;  %v319_v17 = vadd.f32 1.0, %v695_v14 }
  0xfe   : > { %700 = vrcp.f32 %v316_v15  ;;  %v317_v18 = vadd.f32 1.0, %v697_v16 }
  0xff   : > { %702 = vrcp.f32 %v319_v17 }
 0x100   : > { %704 = vrcp.f32 %v317_v18 }
 0x107   : > { %v699_v19 = vpop.eup %698 }
 0x108   : > { %v701_v20 = vpop.eup %700  ;;  %v330_v21 = vmul.f32 %v699_v19, %v625_v3 }
 0x109   : > { %v703_v22 = vpop.eup %702  ;;  %v328_v23 = vmul.f32 %v701_v20, %v289_v5 }
 0x10a   : > { %v705_v24 = vpop.eup %704  ;;  %v331_v25 = vmul.f32 %v703_v22, %v626_v7  ;;  %v339_v26 = vsel %vm332_vm1, %v330_v21, 0.0 }
 0x10b   : > { %v329_v27 = vmul.f32 %v705_v24, %v292_v9  ;;  %340 = vadd.xlane.f32.xlu1 %v339_v26  ;;  %v333_v28 = vsel %vm332_vm1, %v328_v23, 0.0 }
 0x10c   : > { %334 = vadd.xlane.f32.xlu0 %v333_v28  ;;  %v342_v29 = vsel %vm332_vm1, %v331_v25, 0.0 }
 0x10d   : > { %v336_v30 = vsel %vm332_vm1, %v329_v27, 0.0 }
 0x10f   : > { %343 = vadd.xlane.f32.xlu1 %v342_v29 }
 0x110   : > { %337 = vadd.xlane.f32.xlu0 %v336_v30 }
 0x198   : > { %v341_v35 = vpop.xlane.xlu1 %340 }
 0x199   : > { %v335_v36 = vpop.xlane.xlu0 %334  ;;  %v352_v47 = vmul.f32 %v348_v44, %v341_v35 }
 0x19a   : > { %v350_v42 = vmul.f32 %v346_v37, %v335_v36 }
 0x19c   : > { %v344_v40 = vpop.xlane.xlu1 %343 }
 0x19d   : > { %v338_v41 = vpop.xlane.xlu0 %337  ;;  %v353_v45 = vmul.f32 %v349_v39, %v344_v40 }
 0x19e   : > { %v351_v43 = vmul.f32 %v347_v38, %v338_v41 }
 0x19f   : > { %v642_v48 = vpack.c.bf16 %v353_v45, %v352_v47 }
 0x1a0   : > { %v639_v46 = vpack.c.bf16 %v351_v43, %v350_v42 }
 0x1a2   : > { %640 = vmatpush3.bf16.msra.mxu1 %v639_v46 }
 0x1a3   : > { %641 = vmatprep.subr.bf16.mxu1 %v770_v31 }
 0x1a6   : > { %643 = vmatpush3.bf16.msra.mxu1 %v642_v48 }
 0x1a9   : > { %636 = vmatmul.mubr.msk.f32.vlgmr.msra.gmra.mrb[0].mxu1 %vm354_vm4, %v345_v49 }
 0x27c   : > { %v424_v50 = vpop.f32.mrb[0].mxu1 }
 0x27d   : > { %v637_v51 = vpop.f32.mrb[1].mxu1  ;;  %606 = vmatmul.mubr.msk.f32.vlgmr.msra.gmra.mrb[4].mxu0 %vm431_vm5, %v424_v50 }
 0x350   : > { %v506_v52 = vpop.f32.mrb[4].mxu0 }
 0x351   : > { %511 = vst [vmem:[%s218_s10] sm:$0xff] %v506_v52  ;;  %v508_v53 = vpop.f32.mrb[5].mxu0 }
 0x352   : > { %512 = vst [vmem:[%s218_s10 + $0x8] sm:$0xff] %v508_v53 }
 0x353   : > { %719 = shalt.err (!%p716_p3)
}
 0x354   : > { %s720_s26 = scalar_lea.hbm %s884_s15, 256  ;;  %s724_s7 = scalar_lea.hbm %s929_s5, 512 }
 0x355   : > { %p721_p4 = scmp.ne.s32.totalorder %s884_s15, %s720_s26  ;;  %p725_p9 = scmp.lt.u32.totalorder %s884_s15, %s929_s5 }
 0x356   : > { %p726_p10 = scmp.lt.u32.totalorder %s724_s7, %s720_s26  ;;  %p728_p12 = scmp.lt.u32.totalorder %s720_s26, %s884_s15 }
 0x357   : > { %p722_p7 = pnand %p721_p4, %p842_p5 }
 0x358   : > { %p727_p11 = por %p726_p10, %p725_p9 }
 0x359   : > { %p723_p8 = pneg %p722_p7 }
 0x35a   : > { %p729_p13 = por %p728_p12, %p727_p11 }
 0x35c   : > { %p730_p0 = pnand %p729_p13, %p723_p8 }
 0x35e   : > { %733 = shalt.err (!%p730_p0)
}
 0x35f   : > { %644 = dma.vmem_to_hbm [thread:$0]  (%p842_p5), %s879_s11, 256, %s884_s15, %s514_s16  }
 0x360 PF: > { %p650_p1 = scmp.ge.s32.totalorder %s768_s21, 2  ;;  %s540_s10 = sand.u32 1, %s756_s18  }
 0x361   : > { %s541_s12 = scalar_lea.sflag [#allocation3], %s540_s10 }
 0x362   : > { %p647_p2 = pnand %p650_p1, %p846_p6 }
 0x364   : > { %751 = dma.done.wait (!%p647_p2), %s541_s12, 256  }
 0x365   : > { %753 = vsyncadd (!%p647_p2), %s541_s12, 4294967040  ;;  %p15_p3 = scmp.ge.s32.totalorder %s829_s24, 4   ;;  %s932_s18 = smov %s760_s19 }
 0x366   : > { %s933_s19 = smov %s764_s20  ;;  %s934_s20 = smov %s840_s27 }
 0x367   : > { %s935_s21 = smov %s829_s24  ;;  %17 = sbr.rel (!%p15_p3) target bundleno = 3 (0x3), region = 75 }
 0x36e   :  { %546 = vsyncpa [#allocation3], 1 }
 0x36f   :  { %548 = vsyncpa [#allocation3 + $0x1], 1 }

</bundles_post_ra>
